<compile_context>
chip_gen: v6e
topology: v6e:2x2x1
jax: 0.10.0
libtpu: 0.0.40
codegen_flags: <defaults>
</compile_context>

<pallas_src>
import functools
import warnings

import jax
import jax.numpy as jnp
from jax.experimental import pallas as pl
from jax.experimental.pallas import tpu as pltpu

REPEATS = 100  # matches `repeats = 100` in the PyTorch script (idempotent).

_LANE = 128


def _relu_kernel(x_ref, o_ref):
    # ReLU applied REPEATS times == ReLU applied once (bit-identical result),
    # so a single VPU max keeps the kernel HBM-bound instead of VALU-bound.
    o_ref[...] = jnp.maximum(x_ref[...], 0)


@functools.lru_cache(maxsize=None)
def _chip_params():
    """Per-generation (block_bytes, vmem_limit_bytes, two_tensorcores)."""
    kind = ""
    try:
        kind = jax.devices()[0].device_kind.lower()
    except Exception:  # defensive: fall back to conservative defaults
        pass
    if "v7" in kind or "7x" in kind:
        # ~3.2 TB/s HBM per TC: 8 MiB blocks keep the ~0.35 us/step pipeline
        # overhead <10%. 4 double-buffers x 8 MiB = 32 MiB under an explicit
        # 48 MiB limit (64 MiB physical VMEM).
        return 8 << 20, 48 << 20, True
    if "v6" in kind:
        # v6e is already ~85% of roofline at 2 MiB; 4 MiB buys the last ~1-3%.
        return 4 << 20, 64 << 20, False
    if "v4" in kind or "v5p" in kind:
        # Megacore chips: 2 TensorCores, ample VMEM.
        return 4 << 20, 64 << 20, True
    # v5e / unknown: 4 x 2 MiB = 8 MiB stays under the 16 MiB scoped default,
    # and at ~0.82 TB/s the per-step overhead is already <8%.
    return 2 << 20, None, False


def _choose_slab_width(n: int, sublane: int):
    """Largest lane-dense width (multiple of 128) dividing n, preferring rows >= sublane."""
    widths = (4096, 2048, 1024, 512, 256, 128)
    for width in widths:
        if n % width == 0 and n // width >= sublane:
            return width
    for width in widths:
        if n % width == 0:
            return width  # tiny tensor: rows < sublane, single full-extent block
    return None  # ragged size


def _round_up(x: int, m: int) -> int:
    return -(-x // m) * m


def _row_tiling(rows: int, width: int, itemsize: int, sublane: int,
                block_bytes: int, two_cores: bool):
    """Pick (tile_rows, num_blocks) for the 2-D slab."""
    budget_rows = max(sublane,
                      ((block_bytes // (width * itemsize)) // sublane) * sublane)
    num_blocks = pl.cdiv(rows, budget_rows)
    if two_cores:
        if num_blocks == 1 and rows >= 2 * sublane:
            num_blocks = 2          # give both TensorCores work
        elif num_blocks > 1 and num_blocks % 2 == 1:
            num_blocks += 1         # even grid: equal work per TensorCore
    if num_blocks <= 1:
        return rows, 1              # single full-extent block (always layout-legal)
    tile_r = min(_round_up(pl.cdiv(rows, num_blocks), sublane), rows)
    if tile_r == rows:
        return rows, 1
    return tile_r, pl.cdiv(rows, tile_r)


def _relu_forward_impl(x: jax.Array, *, in_place: bool) -> jax.Array:
    """Pallas implementation of ReLUNet.forward (elementwise ReLU, NCHW in/out)."""
    orig_shape = x.shape
    dtype = x.dtype
    n = x.size
    itemsize = jnp.dtype(dtype).itemsize
    sublane = max(8, 32 // max(itemsize, 1))  # 8 for f32, 16 for bf16, 32 for i8

    block_bytes, vmem_limit, two_cores = _chip_params()
    compiler_params = pltpu.CompilerParams(
        dimension_semantics=("parallel",),
        vmem_limit_bytes=vmem_limit,
    )
    cost = pl.CostEstimate(flops=n, transcendentals=0,
                           bytes_accessed=2 * n * itemsize)
    alias = {0: 0} if in_place else {}

    flat = x.reshape(-1)  # bitcast for contiguous inputs
    width = _choose_slab_width(n, sublane)

    if width is not None:
        # Lane-dense 2-D slab; cdiv grid, partial last block masked by Pallas.
        rows = n // width
        slab = flat.reshape(rows, width)
        tile_r, num_blocks = _row_tiling(rows, width, itemsize, sublane,
                                         block_bytes, two_cores)
        out = pl.pallas_call(
            _relu_kernel,
            out_shape=jax.ShapeDtypeStruct((rows, width), dtype),
            grid=(num_blocks,),
            in_specs=[pl.BlockSpec((tile_r, width), lambda i: (i, 0))],
            out_specs=pl.BlockSpec((tile_r, width), lambda i: (i, 0)),
            compiler_params=compiler_params,
            cost_estimate=cost,
            input_output_aliases=alias,
        )(slab)
        return out.reshape(orig_shape)

    # Ragged size (no multiple-of-128 width divides n): run directly on the
    # flat 1-D array. The tile is a multiple of sublane*128 and <= n, so the
    # only partial block is the (Pallas-masked) last one -- no pad / slice
    # HBM round trips.
    chunk = sublane * _LANE
    if n <= chunk:
        tile_e = n                               # single full-extent block
    else:
        budget = max(chunk, ((block_bytes // itemsize) // chunk) * chunk)
        tile_e = min(budget, (n // chunk) * chunk)
    out = pl.pallas_call(
        _relu_kernel,
        out_shape=jax.ShapeDtypeStruct((n,), dtype),
        grid=(pl.cdiv(n, tile_e),),
        in_specs=[pl.BlockSpec((tile_e,), lambda i: (i,))],
        out_specs=pl.BlockSpec((tile_e,), lambda i: (i,)),
        compiler_params=compiler_params,
        cost_estimate=cost,
        input_output_aliases=alias,
    )(flat)
    return out.reshape(orig_shape)


# Default entry point: leaves the caller's input untouched.
relu_net_forward = jax.jit(functools.partial(_relu_forward_impl, in_place=False))

# In-place entry point: the Pallas output aliases the input's HBM buffer
# (input_output_aliases={0: 0}) and jit donates `x`, so no second HBM array is
# allocated. Callers must not reuse `x` after this call.
relu_net_forward_inplace = jax.jit(
    functools.partial(_relu_forward_impl, in_place=True), donate_argnums=0)


if __name__ == "__main__":
    key = jax.random.PRNGKey(0)
    # Small NCHW input consistent with an elementwise activation module.
    x = jax.random.normal(key, (2, 4, 16, 16), dtype=jnp.float32)
    ref = jnp.maximum(x, 0.0)

    y = relu_net_forward(x)
    jax.block_until_ready(y)
    assert y.shape == x.shape and y.dtype == x.dtype
    assert bool(jnp.all(y == ref))

    # Ragged flattened size (1155, not a multiple of 128) exercises the 1-D
    # masked-partial-block path (no pad/slice round trips).
    xr = jax.random.normal(jax.random.PRNGKey(1), (3, 5, 7, 11), dtype=jnp.float32)
    yr = relu_net_forward(xr)
    jax.block_until_ready(yr)
    assert yr.shape == xr.shape
    assert bool(jnp.all(yr == jnp.maximum(xr, 0.0)))

    # In-place variant: output reuses the donated input buffer.
    x2 = jax.random.normal(jax.random.PRNGKey(2), (2, 4, 16, 16), dtype=jnp.float32)
    ref2 = jnp.maximum(x2, 0.0)
    with warnings.catch_warnings():
        # If XLA cannot honor the donation it silently falls back to a copy
        # (still correct); keep that perf-only warning off stderr.
        warnings.simplefilter("ignore")
        y2 = relu_net_forward_inplace(x2)
    jax.block_until_ready(y2)
    assert bool(jnp.all(y2 == ref2))

    print("KERNEL_OK")
</pallas_src>

<mosaic_0001>
module attributes {stable_mosaic.version = 11 : i64} {
  func.func @_relu_kernel(%arg0: i32, %arg1: memref<8x256xf32, #tpu.memory_space<vmem>>, %arg2: memref<8x256xf32, #tpu.memory_space<vmem>>) attributes {dimension_semantics = [#tpu.dimension_semantics<parallel>], iteration_bounds = array<i64: 1>, scalar_prefetch = 0 : i64, scratch_operands = 0 : i64, tpu.core_type = #tpu.core_type<tc>, window_params = [{transform_indices = @transform_0, window_bounds = array<i64: 8, 256>}, {transform_indices = @transform_1, window_bounds = array<i64: 8, 256>}]} {
    %c0 = arith.constant 0 : index
    %c0_0 = arith.constant 0 : index
    %0 = vector.load %arg1[%c0, %c0_0] : memref<8x256xf32, #tpu.memory_space<vmem>>, vector<8x256xf32>
    %cst = arith.constant 0.000000e+00 : f32
    %1 = vector.broadcast %cst : f32 to vector<8x256xf32>
    %2 = arith.maximumf %0, %1 : vector<8x256xf32>
    %c0_1 = arith.constant 0 : index
    %c0_2 = arith.constant 0 : index
    %3 = vector.load %arg2[%c0_1, %c0_2] : memref<8x256xf32, #tpu.memory_space<vmem>>, vector<8x256xf32>
    tpu.vector_store %arg2[%c0_1, %c0_2], %2 {strides = array<i32>} : memref<8x256xf32, #tpu.memory_space<vmem>>, vector<8x256xf32>,
    return
  }
  func.func @transform_0(%arg0: i32) -> (i32, i32) {
    %c0_i32 = arith.constant 0 : i32
    %c0_i32_0 = arith.constant 0 : i32
    return %arg0, %c0_i32 : i32, i32
  }
  func.func @transform_1(%arg0: i32) -> (i32, i32) {
    %c0_i32 = arith.constant 0 : i32
    %c0_i32_0 = arith.constant 0 : i32
    return %arg0, %c0_i32 : i32, i32
  }
}

</mosaic_0001>

<bundles_post_ra>
// kernel: _relu_forward_impl.1
= control target key start
LH: loop header
LB: loop body
LE: loop exit
PB: predicated region body
PF: predicated region fallthrough
CT: control target
= control target key end

     0   :  { %s40_s0 = inlined_call_operand.vmem [shape: f32[8,256], index: 0, kind: input, shape index: {}]   ;;  %s41_s1 = inlined_call_operand.vmem [shape: f32[8,256], index: 1, kind: output, shape index: {}]  }
   0x1   :  { %v8_v0 = vld [vmem:[%s40_s0] sm:$0xff]  ;;  %v9_v1 = vld [vmem:[%s40_s0 + $0x8] sm:$0xff] }
   0x2   :  { %v10_v2 = vmax.f32 %v8_v0, 0.0  ;;  %v11_v3 = vmax.f32 %v9_v1, 0.0 }
   0x4   :  { %12 = vst [vmem:[%s41_s1] sm:$0xff] %v10_v2  ;;  %13 = vst [vmem:[%s41_s1 + $0x8] sm:$0xff] %v11_v3 }

</bundles_post_ra>
